<compile_context>
chip_gen: v7x
topology: tpu7x:2x2x1
jax: 0.10.0
libtpu: 0.0.40
codegen_flags: <defaults>
</compile_context>

<pallas_src>
import jax
import jax.numpy as jnp
from jax.experimental import pallas as pl
from jax.experimental.pallas import tpu as pltpu


def ptame_kernel(x_ref, w1T_ref, b1_ref, w2T_ref, b2_ref, wa2T_ref, ba2_ref,
                 lo_ref, masks_ref):
    TB, _, HW = x_ref.shape
    F = b1_ref.shape[0]
    NC = w2T_ref.shape[0]

    w1T = w1T_ref[...]            # [2F, C+1] fused backbone|attention stage-1 (+ ba1 col)
    w2T = w2T_ref[...]            # [NC, F]   classifier, pre-scaled by 1/HW (GAP folded)
    wa2T = wa2T_ref[...]          # [NC, F]   attention stage-2
    b2 = b2_ref[...]              # [NC, 1]
    ba2 = ba2_ref[...]            # [NC, 1]

    # Hoisted out of the per-sample loops (JAX does not CSE broadcast_in_dim).
    b1f = jnp.broadcast_to(b1_ref[...], (F, HW))                  # [F, HW]
    cls_col = jax.lax.broadcasted_iota(jnp.int32, (NC, 1), 0)     # [NC, 1]
    col2 = jax.lax.broadcasted_iota(jnp.int32, (NC, 2), 1)        # [NC, 2]

    # ------------- pass A: fused stage-1 1x1 convs + backbone GAP -------------
    zb_list, a_list, pooled_cols = [], [], []
    for b in range(TB):                      # static unroll over this block's samples
        xb = x_ref[b]                                               # [C+1, HW] (bf16)
        z = jnp.dot(w1T, xb, preferred_element_type=jnp.float32)    # [2F, HW]  f32 acc
        zb = z[:F, :]                 # bias-free backbone pre-activation (masked reuse)
        a = jnp.maximum(z[F:, :], 0.0)   # attention feats (ba1 already in the matmul)
        h = jnp.maximum(zb + b1f, 0.0)                              # [F, HW]
        # GAP as an XLU lane-reduce; the 1/HW scale is folded into w2T.
        pooled_cols.append(jnp.sum(h, axis=1, keepdims=True))       # [F, 1]
        zb_list.append(zb)
        a_list.append(a)

    pooled = jnp.concatenate(pooled_cols, axis=1) if TB > 1 else pooled_cols[0]  # [F, TB]
    logits = jnp.dot(w2T, pooled, preferred_element_type=jnp.float32) + b2       # [NC, TB]

    # ------ pass B: target select, selected-class saliency, masked backbone ------
    pooled_m_cols = []
    for b in range(TB):
        col = logits[:, b:b + 1]                                     # [NC, 1]
        max_val = jnp.max(col, axis=0, keepdims=True)                # [1, 1]
        # first-occurrence argmax (matches jnp.argmax / torch.argmax tie-break)
        target = jnp.min(jnp.where(col == max_val, cls_col, NC),
                         axis=0, keepdims=True)                      # [1, 1] i32
        onehot = cls_col == target                                   # [NC, 1]

        # single_map_select: only the predicted class's map is ever used, so
        # gather that row of wa2T / ba2 and compute one [1, HW] saliency map.
        w_sel = jnp.sum(jnp.where(onehot, wa2T, 0.0), axis=0, keepdims=True)   # [1, F]
        ba2_sel = jnp.sum(jnp.where(onehot, ba2, 0.0), axis=0, keepdims=True)  # [1, 1]
        sel = jax.nn.sigmoid(
            jnp.dot(w_sel, a_list[b], preferred_element_type=jnp.float32)
            + ba2_sel)                                               # [1, HW]
        masks_ref[b] = sel           # return contract: raw (un-normalized) selected map

        # norm_resize_mask: min-max normalize (resize is identity at equal H,W).
        # Exact divide (not EUP approx) so logits_masked tracks a f32 reference.
        mn = jnp.min(sel, axis=1, keepdims=True)                     # [1, 1]
        mx = jnp.max(sel, axis=1, keepdims=True)                     # [1, 1]
        mask = (sel - mn) / (mx - mn + 1e-8)                         # [1, HW]

        # Masked backbone pass.  Valid because the mask is a per-pixel scalar
        # shared across channels and stage-1 is a bias-after 1x1 conv:
        #   relu(w1^T(mask*x) + b1) == relu(mask*zb + b1)
        hm = jnp.maximum(mask * zb_list[b] + b1f, 0.0)               # [F, HW]
        pooled_m_cols.append(jnp.sum(hm, axis=1, keepdims=True))     # [F, 1]

    pooled_m = (jnp.concatenate(pooled_m_cols, axis=1)
                if TB > 1 else pooled_m_cols[0])                     # [F, TB]
    logits_m = jnp.dot(w2T, pooled_m, preferred_element_type=jnp.float32) + b2  # [NC, TB]

    # merged logits slab: column 0 = logits, column 1 = logits_masked (micro-cost)
    for b in range(TB):
        lo_ref[b] = jnp.where(col2 == 0, logits[:, b:b + 1], logits_m[:, b:b + 1])


def init_params(key, c_in, feat, num_classes):
    ks = jax.random.split(key, 4)
    scale = 0.1
    return {
        "w1": scale * jax.random.normal(ks[0], (c_in, feat), jnp.float32),
        "b1": jnp.zeros((1, feat), jnp.float32),
        "w2": scale * jax.random.normal(ks[1], (feat, num_classes), jnp.float32),
        "b2": jnp.zeros((1, num_classes), jnp.float32),
        "wa1": scale * jax.random.normal(ks[2], (c_in, feat), jnp.float32),
        "ba1": jnp.zeros((1, feat), jnp.float32),
        "wa2": scale * jax.random.normal(ks[3], (feat, num_classes), jnp.float32),
        "ba2": jnp.zeros((1, num_classes), jnp.float32),
    }


def _vmem_capacity_bytes(default=64 * 1024 * 1024):
    try:
        info = pltpu.get_tpu_info()
        cap = getattr(info, "vmem_capacity_bytes", None)
        if cap:
            return int(cap)
    except Exception:
        pass
    return default


def _pick_block_batch(B, Cp, HW, F, in_itemsize, vmem_cap):
    """Largest per-step batch tile that fits a VMEM budget and keeps >= 2 grid
    steps (so the 'parallel' batch axis can split across v7x TensorCores)."""
    budget = vmem_cap // 2

    def step_bytes(tb):
        io = 2 * tb * Cp * HW * in_itemsize + 2 * tb * HW * 4   # double-buffered in/out
        live = tb * 2 * F * HW * 4                              # zb + a held across passes
        transient = 6 * F * HW * 4                              # z/h/hm of in-flight sample
        return io + live + transient

    tb = 1
    for t in range(1, min(B, 8) + 1):
        if B % t != 0:
            continue
        if B // t < min(2, B):
            break
        if step_bytes(t) <= budget:
            tb = t
    return tb


def ptame_forward(images_nchw, params, *, use_bf16=True):
    B, C, H, W = images_nchw.shape
    HW = H * W
    F = params["w1"].shape[1]
    NC = params["w2"].shape[1]

    # Channels-first layout: NCHW reshapes directly to [B, C, HW] (spatial on lanes).
    # Append a ones "channel" so the attention stage-1 bias folds into the fused
    # stage-1 matmul (K: C -> C+1 on a far-from-saturated MXU contraction dim).
    x = images_nchw.reshape(B, C, HW)
    x = jnp.concatenate([x, jnp.ones((B, 1, HW), x.dtype)], axis=1)        # [B, C+1, HW]

    ba1 = params["ba1"].reshape(F, 1)
    w1T = jnp.concatenate([params["w1"], params["wa1"]], axis=1).T          # [2F, C]
    bias_col = jnp.concatenate([jnp.zeros((F, 1), jnp.float32), ba1], 0)    # [2F, 1]
    w1T = jnp.concatenate([w1T, bias_col], axis=1)                          # [2F, C+1]
    # backbone half of the bias column stays 0 so zb is bias-free (masked-pass reuse).

    in_dtype = jnp.bfloat16 if use_bf16 else jnp.float32
    x = x.astype(in_dtype)          # halves HBM traffic; bf16 MXU on v6e/v7x
    w1T = w1T.astype(in_dtype)

    b1 = params["b1"].reshape(F, 1).astype(jnp.float32)
    w2T = (params["w2"].T * (1.0 / HW)).astype(jnp.float32)                 # GAP scale folded
    b2 = params["b2"].reshape(NC, 1).astype(jnp.float32)
    wa2T = params["wa2"].T.astype(jnp.float32)
    ba2 = params["ba2"].reshape(NC, 1).astype(jnp.float32)

    vmem_cap = _vmem_capacity_bytes()
    TB = _pick_block_batch(B, C + 1, HW, F, jnp.dtype(in_dtype).itemsize, vmem_cap)
    grid = (B // TB,)

    def full2d(arr):
        return pl.BlockSpec(arr.shape, lambda g: (0, 0))

    grid_spec = pltpu.PrefetchScalarGridSpec(
        num_scalar_prefetch=0,
        grid=grid,
        in_specs=[
            pl.BlockSpec((TB, C + 1, HW), lambda g: (g, 0, 0)),
            full2d(w1T), full2d(b1), full2d(w2T), full2d(b2),
            full2d(wa2T), full2d(ba2),
        ],
        out_specs=[
            pl.BlockSpec((TB, NC, 2), lambda g: (g, 0, 0)),    # logits | logits_masked
            pl.BlockSpec((TB, 1, HW), lambda g: (g, 0, 0)),    # selected maps (lane-dense)
        ],
    )

    lo, masks3 = pl.pallas_call(
        ptame_kernel,
        out_shape=(
            jax.ShapeDtypeStruct((B, NC, 2), jnp.float32),
            jax.ShapeDtypeStruct((B, 1, HW), jnp.float32),
        ),
        grid_spec=grid_spec,
        compiler_params=pltpu.CompilerParams(
            dimension_semantics=("parallel",),
            vmem_limit_bytes=int(min(0.75 * vmem_cap, 96 * 1024 * 1024)),
        ),
    )(x, w1T, b1, w2T, b2, wa2T, ba2)

    logits = lo[:, :, 0]
    logits_masked = lo[:, :, 1]
    masks = masks3.reshape(B, H, W)
    targets = jnp.argmax(logits, axis=1)   # same f32 values & tie-break as in-kernel
    # return_keys = ['logits', 'masks', 'logits_masked', 'targets']
    return {
        "logits": logits,
        "masks": masks,
        "logits_masked": logits_masked,
        "targets": targets,
    }


if __name__ == "__main__":
    # TODO(synk): hooks / dynamic pipeline dispatch and training-mode
    # random_map_select are Python-level control flow with no kernel equivalent;
    # this implements the eval-mode forward pass.
    B, C, H, W = 2, 4, 16, 16
    FEAT, NUM_CLASSES = 32, 8

    key = jax.random.PRNGKey(0)
    k_img, k_par = jax.random.split(key)
    images = jax.random.normal(k_img, (B, C, H, W), jnp.float32)
    params = init_params(k_par, C, FEAT, NUM_CLASSES)

    out = ptame_forward(images, params)
    jax.block_until_ready(out)

    assert out["logits"].shape == (B, NUM_CLASSES)
    assert out["logits_masked"].shape == (B, NUM_CLASSES)
    assert out["masks"].shape == (B, H, W)
    assert out["targets"].shape == (B,)
    assert bool(jnp.all(jnp.isfinite(out["logits"])))
    assert bool(jnp.all(jnp.isfinite(out["logits_masked"])))
    assert bool(jnp.all(jnp.isfinite(out["masks"])))
    print("KERNEL_OK")
</pallas_src>

<mosaic_0001>
module attributes {stable_mosaic.version = 11 : i64} {
  func.func @ptame_kernel(%arg0: i32, %arg1: memref<1x5x256xbf16, #tpu.memory_space<vmem>>, %arg2: memref<64x5xbf16, #tpu.memory_space<vmem>>, %arg3: memref<32x1xf32, #tpu.memory_space<vmem>>, %arg4: memref<8x32xf32, #tpu.memory_space<vmem>>, %arg5: memref<8x1xf32, #tpu.memory_space<vmem>>, %arg6: memref<8x32xf32, #tpu.memory_space<vmem>>, %arg7: memref<8x1xf32, #tpu.memory_space<vmem>>, %arg8: memref<1x8x2xf32, #tpu.memory_space<vmem>>, %arg9: memref<1x1x256xf32, #tpu.memory_space<vmem>>) attributes {dimension_semantics = [#tpu.dimension_semantics<parallel>], iteration_bounds = array<i64: 2>, scalar_prefetch = 0 : i64, scratch_operands = 0 : i64, tpu.core_type = #tpu.core_type<tc>, window_params = [{transform_indices = @transform_0, window_bounds = array<i64: 1, 5, 256>}, {pipeline_mode = #tpu.pipeline_mode<synchronous>, transform_indices = @transform_1, window_bounds = array<i64: 64, 5>}, {pipeline_mode = #tpu.pipeline_mode<synchronous>, transform_indices = @transform_2, window_bounds = array<i64: 32, 1>}, {pipeline_mode = #tpu.pipeline_mode<synchronous>, transform_indices = @transform_3, window_bounds = array<i64: 8, 32>}, {pipeline_mode = #tpu.pipeline_mode<synchronous>, transform_indices = @transform_4, window_bounds = array<i64: 8, 1>}, {pipeline_mode = #tpu.pipeline_mode<synchronous>, transform_indices = @transform_5, window_bounds = array<i64: 8, 32>}, {pipeline_mode = #tpu.pipeline_mode<synchronous>, transform_indices = @transform_6, window_bounds = array<i64: 8, 1>}, {transform_indices = @transform_7, window_bounds = array<i64: 1, 8, 2>}, {transform_indices = @transform_8, window_bounds = array<i64: 1, 1, 256>}]} {
    %c0 = arith.constant 0 : index
    %c0_0 = arith.constant 0 : index
    %0 = vector.load %arg2[%c0, %c0_0] : memref<64x5xbf16, #tpu.memory_space<vmem>>, vector<64x5xbf16>
    %c0_1 = arith.constant 0 : index
    %c0_2 = arith.constant 0 : index
    %1 = vector.load %arg4[%c0_1, %c0_2] : memref<8x32xf32, #tpu.memory_space<vmem>>, vector<8x32xf32>
    %c0_3 = arith.constant 0 : index
    %c0_4 = arith.constant 0 : index
    %2 = vector.load %arg6[%c0_3, %c0_4] : memref<8x32xf32, #tpu.memory_space<vmem>>, vector<8x32xf32>
    %c0_5 = arith.constant 0 : index
    %c0_6 = arith.constant 0 : index
    %3 = vector.load %arg5[%c0_5, %c0_6] : memref<8x1xf32, #tpu.memory_space<vmem>>, vector<8x1xf32>
    %c0_7 = arith.constant 0 : index
    %c0_8 = arith.constant 0 : index
    %4 = vector.load %arg7[%c0_7, %c0_8] : memref<8x1xf32, #tpu.memory_space<vmem>>, vector<8x1xf32>
    %c0_9 = arith.constant 0 : index
    %c0_10 = arith.constant 0 : index
    %5 = vector.load %arg3[%c0_9, %c0_10] : memref<32x1xf32, #tpu.memory_space<vmem>>, vector<32x1xf32>
    %6 = vector.shape_cast %5 : vector<32x1xf32> to vector<32x1xf32>
    %7 = vector.broadcast %6 : vector<32x1xf32> to vector<32x256xf32>
    %8 = tpu.iota {dimensions = array<i32: 0>} : vector<8x1xi32>
    %9 = tpu.iota {dimensions = array<i32: 1>} : vector<8x2xi32>
    %c0_11 = arith.constant 0 : index
    %c0_12 = arith.constant 0 : index
    %c0_13 = arith.constant 0 : index
    %10 = vector.load %arg1[%c0_11, %c0_12, %c0_13] : memref<1x5x256xbf16, #tpu.memory_space<vmem>>, vector<1x5x256xbf16>
    %11 = vector.shape_cast %10 : vector<1x5x256xbf16> to vector<5x256xbf16>
    %cst = arith.constant dense<0.000000e+00> : vector<64x256xf32>
    %12 = tpu.matmul %0, %11, %cst {dimension_numbers = #tpu.dot_dimension_numbers<[1], [0], [0], [1], [0, 0, 1, 1], [], []>} : vector<64x5xbf16>, vector<5x256xbf16>, vector<64x256xf32> -> vector<64x256xf32>
    %13 = vector.extract_strided_slice %12 {offsets = [0, 0], sizes = [32, 256], strides = [1, 1]} : vector<64x256xf32> to vector<32x256xf32>
    %14 = vector.extract_strided_slice %12 {offsets = [32, 0], sizes = [32, 256], strides = [1, 1]} : vector<64x256xf32> to vector<32x256xf32>
    %cst_14 = arith.constant 0.000000e+00 : f32
    %15 = vector.broadcast %cst_14 : f32 to vector<32x256xf32>
    %16 = arith.maximumf %14, %15 : vector<32x256xf32>
    %17 = arith.addf %13, %7 : vector<32x256xf32>
    %cst_15 = arith.constant 0.000000e+00 : f32
    %18 = vector.broadcast %cst_15 : f32 to vector<32x256xf32>
    %19 = arith.maximumf %17, %18 : vector<32x256xf32>
    %cst_16 = arith.constant dense<0.000000e+00> : vector<32xf32>
    %20 = vector.multi_reduction <add>, %19, %cst_16 [1] : vector<32x256xf32> to vector<32xf32>
    %21 = vector.shape_cast %20 : vector<32xf32> to vector<32x1xf32>
    %cst_17 = arith.constant dense<0.000000e+00> : vector<8x1xf32>
    %22 = tpu.matmul %1, %21, %cst_17 {dimension_numbers = #tpu.dot_dimension_numbers<[1], [0], [0], [1], [0, 0, 1, 1], [], []>} : vector<8x32xf32>, vector<32x1xf32>, vector<8x1xf32> -> vector<8x1xf32>
    %23 = arith.addf %22, %3 : vector<8x1xf32>
    %cst_18 = arith.constant dense<0xFF800000> : vector<1xf32>
    %24 = vector.multi_reduction <maximumf>, %23, %cst_18 [0] : vector<8x1xf32> to vector<1xf32>
    %25 = vector.shape_cast %24 : vector<1xf32> to vector<1x1xf32>
    %26 = vector.broadcast %25 : vector<1x1xf32> to vector<8x1xf32>
    %27 = arith.cmpf oeq, %23, %26 : vector<8x1xf32>
    %c8_i32 = arith.constant 8 : i32
    %28 = vector.broadcast %c8_i32 : i32 to vector<8x1xi32>
    %29 = arith.select %27, %8, %28 : vector<8x1xi1>, vector<8x1xi32>
    %cst_19 = arith.constant dense<2147483647> : vector<1xi32>
    %30 = vector.multi_reduction <minsi>, %29, %cst_19 [0] : vector<8x1xi32> to vector<1xi32>
    %31 = vector.shape_cast %30 : vector<1xi32> to vector<1x1xi32>
    %32 = vector.broadcast %31 : vector<1x1xi32> to vector<8x1xi32>
    %33 = arith.cmpi eq, %8, %32 : vector<8x1xi32>
    %cst_20 = arith.constant 0.000000e+00 : f32
    %34 = vector.shape_cast %33 : vector<8x1xi1> to vector<8x1xi1>
    %35 = vector.broadcast %34 : vector<8x1xi1> to vector<8x32xi1>
    %36 = vector.broadcast %cst_20 : f32 to vector<8x32xf32>
    %37 = arith.select %35, %2, %36 : vector<8x32xi1>, vector<8x32xf32>
    %cst_21 = arith.constant dense<0.000000e+00> : vector<32xf32>
    %38 = vector.multi_reduction <add>, %37, %cst_21 [0] : vector<8x32xf32> to vector<32xf32>
    %39 = vector.shape_cast %38 : vector<32xf32> to vector<1x32xf32>
    %cst_22 = arith.constant 0.000000e+00 : f32
    %40 = vector.broadcast %cst_22 : f32 to vector<8x1xf32>
    %41 = arith.select %33, %4, %40 : vector<8x1xi1>, vector<8x1xf32>
    %cst_23 = arith.constant dense<0.000000e+00> : vector<1xf32>
    %42 = vector.multi_reduction <add>, %41, %cst_23 [0] : vector<8x1xf32> to vector<1xf32>
    %43 = vector.shape_cast %42 : vector<1xf32> to vector<1x1xf32>
    %cst_24 = arith.constant dense<0.000000e+00> : vector<1x256xf32>
    %44 = tpu.matmul %39, %16, %cst_24 {dimension_numbers = #tpu.dot_dimension_numbers<[1], [0], [0], [1], [0, 0, 1, 1], [], []>} : vector<1x32xf32>, vector<32x256xf32>, vector<1x256xf32> -> vector<1x256xf32>
    %45 = vector.broadcast %43 : vector<1x1xf32> to vector<1x256xf32>
    %46 = arith.addf %44, %45 : vector<1x256xf32>
    %47 = arith.negf %46 : vector<1x256xf32>
    %48 = math.exp %47 : vector<1x256xf32>
    %cst_25 = arith.constant 1.000000e+00 : f32
    %49 = vector.broadcast %cst_25 : f32 to vector<1x256xf32>
    %50 = arith.addf %49, %48 : vector<1x256xf32>
    %51 = arith.divf %49, %50 : vector<1x256xf32>
    %c0_26 = arith.constant 0 : index
    %c0_27 = arith.constant 0 : index
    %c0_28 = arith.constant 0 : index
    %52 = vector.load %arg9[%c0_26, %c0_27, %c0_28] : memref<1x1x256xf32, #tpu.memory_space<vmem>>, vector<1x1x256xf32>
    %53 = vector.shape_cast %52 : vector<1x1x256xf32> to vector<1x256xf32>
    %54 = vector.shape_cast %51 : vector<1x256xf32> to vector<1x1x256xf32>
    tpu.vector_store %arg9[%c0_26, %c0_27, %c0_28], %54 {strides = array<i32>} : memref<1x1x256xf32, #tpu.memory_space<vmem>>, vector<1x1x256xf32>,
    %cst_29 = arith.constant dense<0x7F800000> : vector<1xf32>
    %55 = vector.multi_reduction <minimumf>, %51, %cst_29 [1] : vector<1x256xf32> to vector<1xf32>
    %56 = vector.shape_cast %55 : vector<1xf32> to vector<1x1xf32>
    %cst_30 = arith.constant dense<0xFF800000> : vector<1xf32>
    %57 = vector.multi_reduction <maximumf>, %51, %cst_30 [1] : vector<1x256xf32> to vector<1xf32>
    %58 = vector.shape_cast %57 : vector<1xf32> to vector<1x1xf32>
    %59 = vector.broadcast %56 : vector<1x1xf32> to vector<1x256xf32>
    %60 = arith.subf %51, %59 : vector<1x256xf32>
    %61 = arith.subf %58, %56 : vector<1x1xf32>
    %cst_31 = arith.constant 9.99999993E-9 : f32
    %62 = vector.broadcast %cst_31 : f32 to vector<1x1xf32>
    %63 = arith.addf %61, %62 : vector<1x1xf32>
    %64 = vector.broadcast %63 : vector<1x1xf32> to vector<1x256xf32>
    %65 = arith.divf %60, %64 : vector<1x256xf32>
    %66 = vector.broadcast %65 : vector<1x256xf32> to vector<32x256xf32>
    %67 = arith.mulf %66, %13 : vector<32x256xf32>
    %68 = arith.addf %67, %7 : vector<32x256xf32>
    %cst_32 = arith.constant 0.000000e+00 : f32
    %69 = vector.broadcast %cst_32 : f32 to vector<32x256xf32>
    %70 = arith.maximumf %68, %69 : vector<32x256xf32>
    %cst_33 = arith.constant dense<0.000000e+00> : vector<32xf32>
    %71 = vector.multi_reduction <add>, %70, %cst_33 [1] : vector<32x256xf32> to vector<32xf32>
    %72 = vector.shape_cast %71 : vector<32xf32> to vector<32x1xf32>
    %cst_34 = arith.constant dense<0.000000e+00> : vector<8x1xf32>
    %73 = tpu.matmul %1, %72, %cst_34 {dimension_numbers = #tpu.dot_dimension_numbers<[1], [0], [0], [1], [0, 0, 1, 1], [], []>} : vector<8x32xf32>, vector<32x1xf32>, vector<8x1xf32> -> vector<8x1xf32>
    %74 = arith.addf %73, %3 : vector<8x1xf32>
    %c0_i32 = arith.constant 0 : i32
    %75 = vector.broadcast %c0_i32 : i32 to vector<8x2xi32>
    %76 = arith.cmpi eq, %9, %75 : vector<8x2xi32>
    %77 = vector.shape_cast %23 : vector<8x1xf32> to vector<8x1xf32>
    %78 = vector.broadcast %77 : vector<8x1xf32> to vector<8x2xf32>
    %79 = vector.shape_cast %74 : vector<8x1xf32> to vector<8x1xf32>
    %80 = vector.broadcast %79 : vector<8x1xf32> to vector<8x2xf32>
    %81 = arith.select %76, %78, %80 : vector<8x2xi1>, vector<8x2xf32>
    %c0_35 = arith.constant 0 : index
    %c0_36 = arith.constant 0 : index
    %c0_37 = arith.constant 0 : index
    %82 = vector.load %arg8[%c0_35, %c0_36, %c0_37] : memref<1x8x2xf32, #tpu.memory_space<vmem>>, vector<1x8x2xf32>
    %83 = vector.shape_cast %82 : vector<1x8x2xf32> to vector<8x2xf32>
    %84 = vector.shape_cast %81 : vector<8x2xf32> to vector<1x8x2xf32>
    tpu.vector_store %arg8[%c0_35, %c0_36, %c0_37], %84 {strides = array<i32>} : memref<1x8x2xf32, #tpu.memory_space<vmem>>, vector<1x8x2xf32>,
    return
  }
  func.func @transform_0(%arg0: i32) -> (i32, i32, i32) {
    %c0_i32 = arith.constant 0 : i32
    %c0_i32_0 = arith.constant 0 : i32
    %c0_i32_1 = arith.constant 0 : i32
    return %arg0, %c0_i32, %c0_i32_0 : i32, i32, i32
  }
  func.func @transform_1(%arg0: i32) -> (i32, i32) {
    %c0_i32 = arith.constant 0 : i32
    %c0_i32_0 = arith.constant 0 : i32
    %c0_i32_1 = arith.constant 0 : i32
    return %c0_i32, %c0_i32_0 : i32, i32
  }
  func.func @transform_2(%arg0: i32) -> (i32, i32) {
    %c0_i32 = arith.constant 0 : i32
    %c0_i32_0 = arith.constant 0 : i32
    %c0_i32_1 = arith.constant 0 : i32
    return %c0_i32, %c0_i32_0 : i32, i32
  }
  func.func @transform_3(%arg0: i32) -> (i32, i32) {
    %c0_i32 = arith.constant 0 : i32
    %c0_i32_0 = arith.constant 0 : i32
    %c0_i32_1 = arith.constant 0 : i32
    return %c0_i32, %c0_i32_0 : i32, i32
  }
  func.func @transform_4(%arg0: i32) -> (i32, i32) {
    %c0_i32 = arith.constant 0 : i32
    %c0_i32_0 = arith.constant 0 : i32
    %c0_i32_1 = arith.constant 0 : i32
    return %c0_i32, %c0_i32_0 : i32, i32
  }
  func.func @transform_5(%arg0: i32) -> (i32, i32) {
    %c0_i32 = arith.constant 0 : i32
    %c0_i32_0 = arith.constant 0 : i32
    %c0_i32_1 = arith.constant 0 : i32
    return %c0_i32, %c0_i32_0 : i32, i32
  }
  func.func @transform_6(%arg0: i32) -> (i32, i32) {
    %c0_i32 = arith.constant 0 : i32
    %c0_i32_0 = arith.constant 0 : i32
    %c0_i32_1 = arith.constant 0 : i32
    return %c0_i32, %c0_i32_0 : i32, i32
  }
  func.func @transform_7(%arg0: i32) -> (i32, i32, i32) {
    %c0_i32 = arith.constant 0 : i32
    %c0_i32_0 = arith.constant 0 : i32
    %c0_i32_1 = arith.constant 0 : i32
    return %arg0, %c0_i32, %c0_i32_0 : i32, i32, i32
  }
  func.func @transform_8(%arg0: i32) -> (i32, i32, i32) {
    %c0_i32 = arith.constant 0 : i32
    %c0_i32_0 = arith.constant 0 : i32
    %c0_i32_1 = arith.constant 0 : i32
    return %arg0, %c0_i32, %c0_i32_0 : i32, i32, i32
  }
}

</mosaic_0001>

<bundles_post_ra>
// kernel: tpu_custom_call.1
= control target key start
LH: loop header
LB: loop body
LE: loop exit
PB: predicated region body
PF: predicated region fallthrough
CT: control target
= control target key end

     0   :  { %s1512_s0 = inlined_call_operand.vmem [shape: bf16[2,5,256], index: 0, kind: input, shape index: {}]   ;;  %s1513_s1 = inlined_call_operand.vmem [shape: bf16[64,5], index: 1, kind: input, shape index: {}]   ;;  %s1514_s2 = inlined_call_operand.vmem [shape: f32[32,1], index: 2, kind: input, shape index: {}]   ;;  %s1515_s3 = inlined_call_operand.vmem [shape: f32[8,32], index: 3, kind: input, shape index: {}]   ;;  %s1516_s4 = inlined_call_operand.vmem [shape: f32[8,1], index: 4, kind: input, shape index: {}]   ;;  %s1517_s5 = inlined_call_operand.vmem [shape: f32[8,32], index: 5, kind: input, shape index: {}]   ;;  %s1518_s6 = inlined_call_operand.vmem [shape: f32[8,1], index: 6, kind: input, shape index: {}]   ;;  %s1519_s7 = inlined_call_operand.vmem [shape: f32[2,8,2], index: 7, kind: output, shape index: {0}]   ;;  %s1520_s8 = inlined_call_operand.hbm [shape: f32[2,1,256], index: 8, kind: output, shape index: {1}]  }
   0x1   :  { %1522 = sst [smem:[#allocation5_spill]] %s1512_s0 }
   0x2   :  { %14 = vsyncpa [#allocation3], 0 }
   0x3   :  { %16 = vsyncpa [#allocation3 + $0x1], 0  ;;  %s1256_s27 = smov 0   ;;  %s1258_s28 = smov 0  }
   0x4   :  { %s1260_s29 = smov 0   ;;  %s1262_s30 = smov 0  }
   0x5 LB: > { %s1277_s9 = sadd.s32 4294967295, %s1202_s30   ;;  %s995_s10 = sadd.s32 4294967294, %s1202_s30   ;;  %s1202_s30 = sphi %s1262_s30, %s1530_s30   ;;  %s1198_s29 = sphi %s1260_s29, %s1529_s29   ;;  %s1194_s28 = sphi %s1258_s28, %s1528_s28   ;;  %s1190_s27 = sphi %s1256_s27, %s1527_s27  }
   0x6   : > { %s1281_s11 = sadd.s32 1, %s1202_s30   ;;  %s207_s12 = sadd.s32 1, %s1198_s29 }
   0x7   : > { %s204_s13 = ssub.s32 %s1202_s30, %s1281_s11  ;;  %p217_p0 = scmp.ne.s32.totalorder %s1198_s29, %s1194_s28 }
   0x8   : > { %p205_p1 = scmp.eq.s32.totalorder %s204_s13, 0  ;;  %p218_p2 = scmp.eq.s32.totalorder %s1277_s9, 1 }
   0x9   : > { %p223_p3 = scmp.ne.s32.totalorder %s1194_s28, %s1190_s27  ;;  %p224_p4 = scmp.eq.s32.totalorder %s995_s10, 1 }
   0xa   : > { %s1292_s14 = scalar_select %p205_p1, %s1198_s29, %s207_s12  }
   0xb   : > { %p1294_p5 = por %p218_p2, %p217_p0  ;;  %p1298_p6 = por %p224_p4, %p223_p3 }
   0xc   : > { %p998_p7 = scmp.ge.s32.totalorder %s1202_s30, 1  ;;  %p268_p8 = scmp.lt.s32.totalorder %s1202_s30, 3 }
   0xe   : > { %p269_p9 = pnand %p998_p7, %p268_p8 }
   0xf   : > { %p306_p10 = scmp.lt.s32.totalorder (!%p269_p9), %s1277_s9, 1  ;;  %vm395_vm0 = vcmask (!%p269_p9), 1041408   ;;  %v1204_v0 = vmov (!%p269_p9), 0   ;;  %vm396_vm1 = vcmask (!%p269_p9), 1042432   ;;  %v1205_v1 = vmov (!%p269_p9), 65535   ;;  %v328_v3 = vld [vmem:[%s1514_s2] sm:$0xff] (!%p269_p9) }
  0x10   : > { %272 = sbr.rel (%p269_p9) target bundleno = 1709 (0x6ad), region = 48  ;;  %437 = vmatprep.mubr.bf16.mxu0 (!%p269_p9), %v1204_v0  ;;  %1122 = vset.pattern.permute.xlu0 (!%p269_p9), %v1204_v0  ;;  %v397_v2 = vsel (!%p269_p9), %vm395_vm0, 4294967295, %v1205_v1  ;;  %v329_v4 = vld [vmem:[%s1514_s2 + $0x8] sm:$0xff] (!%p269_p9)  ;;  %v330_v5 = vld [vmem:[%s1514_s2 + $0x10] sm:$0xff] (!%p269_p9)  ;;  %s1525_s0 = sld [smem:[#allocation5_spill]] (!%p269_p9)  ;;  %v331_v8 = vld [vmem:[%s1514_s2 + $0x18] sm:$0xff] (!%p269_p9) }
  0x11   : > { %1123 = vset.pattern.permute.xlu1 (!%p269_p9), %v1204_v0  ;;  %334 = vperm.xlu0 (!%p269_p9), %1122, %v328_v3   ;;  %v398_v7 = vsel (!%p269_p9), %vm396_vm1, %v397_v2, 0  ;;  %v1126_v13 = vld [vmem:[%s1513_s1] sm:$0xff] (!%p269_p9)   ;;  %vm382_vm2 = vcmask (!%p269_p9), 39936   ;;  %v1127_v14 = vld [vmem:[%s1513_s1 + $0x8] sm:$0xff] (!%p269_p9)   ;;  %v1206_v47 = vmov (!%p269_p9), 0.0|0.0   ;;  %vm1207_vm3 = vmmov (!%p269_p9), 0  }
  0x12   : > { %344 = vperm.xlu1 (!%p269_p9), %1123, %v330_v5   ;;  %1057 = vmatprep.subr.bf16.mxu1 (!%p269_p9), %v1206_v47  ;;  %v1208_v48 = vmov (!%p269_p9), 0.0   ;;  %v1128_v49 = vld [vmem:[%s1513_s1 + $0x10] sm:$0xff] (!%p269_p9)   ;;  %v1129_v50 = vld [vmem:[%s1513_s1 + $0x18] sm:$0xff] (!%p269_p9)   ;;  %v1395_v57 = vld [vmem:[%s1515_s3] sm:$0xff] (!%p269_p9)  ;;  %vm514_vm4 = vcmask (!%p269_p9), 261120   ;;  %vm588_vm5 = vcmask (!%p269_p9), 7168  }
  0x13   : > { %1043 = vmatprep.mubr.msk.f32.mxu1 (!%p269_p9), %vm1207_vm3, %v1208_v48  ;;  %v1403_v5 = vld [vmem:[%s1516_s4] sm:$0xff] (!%p269_p9)  ;;  %vm744_vm12 = vcmask (!%p269_p9), 1040384   ;;  %s303_s24 = sand.u32 (!%p269_p9), 1, %s1194_s28   ;;  %s1210_s23 = smov (!%p269_p9), [#allocation2]  }
  0x14   : > { %s1434_s25 = sshll.u32 (!%p269_p9), %s303_s24, 1  ;;  %s895_s21 = scalar_lea.sflag (!%p269_p9), [#allocation3], %s303_s24 }
  0x15   : > { %339 = vperm.xlu0 (!%p269_p9), %1122, %v329_v4   ;;  %s305_s26 = scalar_lea.vmem (!%p269_p9), [#allocation2], %s1434_s25 }
  0x16   : > { %349 = vperm.xlu1 (!%p269_p9), %1123, %v331_v8   ;;  %s912_s12 = sshll.u32 (!%p269_p9), %s305_s26, 4  ;;  %s913_s12 = int_to_ptr.vmem [resolvable:$true] %s912_s12 }
  0x17   : > { %s1308_s17 = scalar_select %p306_p10, %s1277_s9, 1 }
  0x18   : > { %s1140_s22 = scalar_lea.vmem %s913_s12, 32 }
  0x19   : > { %s1521_s20 = sshll.u32 %s1308_s17, 3  ;;  %p1141_p11 = scmp.ne.s32.totalorder %s913_s12, %s1140_s22 }
  0x1a   : > { %s310_s10 = scalar_lea.vmem %s1525_s0, %s1521_s20  ;;  %s1144_s20 = sshll.u32 %s1210_s23, 4  ;;  %s1145_s20 = int_to_ptr.vmem [resolvable:$false] %s1144_s20 }
  0x1b   : > { %v356_v6 = vld [vmem:[%s310_s10] sm:$0x77]  ;;  %s1024_s10 = sshll.u32 %s1277_s9, 5  ;;  %p1142_p12 = pnand %p1141_p11, %p1294_p5 }
  0x1c   : > { %v1008_v9 = vcombine.high %v356_v6, %v356_v6  ;;  %v1007_v10 = vcombine.low %v356_v6, %v356_v6  ;;  %s1468_s19 = scalar_lea.hbm %s1520_s8, %s1024_s10  ;;  %s1146_s0 = scalar_lea.vmem %s1145_s20, 64 }
  0x1d   : > { %p1143_p13 = pneg %p1142_p12  ;;  %p1147_p0 = scmp.lt.s32.totalorder %s913_s12, %s1145_s20 }
  0x1e   : > { %v403_v11 = vand.u32 %v1008_v9, %v398_v7  ;;  %v400_v12 = vand.u32 %v1007_v10, %v398_v7  ;;  %p1148_p1 = scmp.lt.s32.totalorder %s1146_s0, %s1140_s22 }
  0x20   : > { %405 = vmatprep.subr.bf16.mxu0 %v403_v11  ;;  %p1149_p2 = por %p1148_p1, %p1147_p0 }
  0x21   : > { %406 = vmatpush1.bf16.msra.mxu0 %v400_v12 }
  0x22   : > { %p1150_p3 = pnand %p1149_p2, %p1143_p13 }
  0x24   : > { %1009 = vmatmul.mubr.msk.bf16.vlgmr.msra.gmra.mrb[0].mxu0 %vm382_vm2, %v1126_v13  ;;  %v352_v13 = vlaneseq }
  0x25   : > { %447 = vmatprep.mubr.bf16.mxu0 %v1204_v0 }
  0x26   : > { %vm741_vm13 = vcmp.lt.s32.totalorder %v352_v13, 256 }
  0x2c   : > { %1010 = vmatmul.mubr.msk.bf16.gmra.mrb[4].mxu0 %vm382_vm2, %v1127_v14 }
  0x2d   : > { %457 = vmatprep.mubr.bf16.mxu0 %v1204_v0 }
  0x34   : > { %1011 = vmatmul.mubr.msk.bf16.gmra.mrb[8].mxu0 %vm382_vm2, %v1128_v49 }
  0x35   : > { %467 = vmatprep.mubr.bf16.mxu0 %v1204_v0 }
  0x3c   : > { %1012 = vmatmul.mubr.msk.bf16.gmra.mrb[12].mxu0 %vm382_vm2, %v1129_v50 }
  0x90   : > { %v1339_v15 = vpop.permute.xlu0 %334 }
  0x91   : > { %v1353_v22 = vpop.permute.xlu1 %344 }
  0x94   : > { %v1343_v17 = vpop.permute.xlu0 %339 }
  0x95   : > { %v1363_v32 = vpop.permute.xlu1 %349 }
  0xf7   : > { %v1341_v16 = vpop.f32.mrb[0].mxu0 }
  0xf8   : > { %v486_v18 = vadd.f32 %v1341_v16, %v1339_v15  ;;  %v1347_v19 = vpop.f32.mrb[1].mxu0 }
  0xf9   : > { %v487_v20 = vadd.f32 %v1347_v19, %v1339_v15  ;;  %v1351_v21 = vpop.f32.mrb[2].mxu0 }
  0xfa   : > { %v494_v23 = vmax.f32 %v486_v18, 0.0  ;;  %v488_v24 = vadd.f32 %v1351_v21, %v1343_v17  ;;  %v1357_v25 = vpop.f32.mrb[3].mxu0 }
  0xfb   : > { %v495_v26 = vmax.f32 %v487_v20, 0.0  ;;  %v489_v27 = vadd.f32 %v1357_v25, %v1343_v17  ;;  %v1411_v20 = vshrl.u32 %v352_v13, 7 }
  0xfc   : > { %v496_v28 = vmax.f32 %v488_v24, 0.0 }
  0xfd   : > { %v497_v29 = vmax.f32 %v489_v27, 0.0  ;;  %v502_v30 = vadd.f32 %v495_v26, %v494_v23 }
  0xff   : > { %503 = vadd.xlane.f32.xlu0 %v502_v30  ;;  %v1361_v31 = vpop.f32.mrb[4].mxu0  ;;  %v505_v33 = vadd.f32 %v497_v29, %v496_v28 }
 0x100   : > { %v490_v34 = vadd.f32 %v1361_v31, %v1353_v22  ;;  %v1367_v35 = vpop.f32.mrb[5].mxu0 }
 0x101   : > { %v491_v36 = vadd.f32 %v1367_v35, %v1353_v22  ;;  %506 = vadd.xlane.f32.xlu1 %v505_v33  ;;  %v1371_v37 = vpop.f32.mrb[6].mxu0 }
 0x102   : > { %v498_v38 = vmax.f32 %v490_v34, 0.0  ;;  %v492_v39 = vadd.f32 %v1371_v37, %v1363_v32  ;;  %v1375_v40 = vpop.f32.mrb[7].mxu0  ;;  %v327_v34 = vld [vmem:[%s1518_s6] sm:$0xff] }
 0x103   : > { %v499_v41 = vmax.f32 %v491_v36, 0.0  ;;  %v493_v42 = vadd.f32 %v1375_v40, %v1363_v32 }
 0x104   : > { %v500_v43 = vmax.f32 %v492_v39, 0.0 }
 0x105   : > { %v501_v44 = vmax.f32 %v493_v42, 0.0  ;;  %v508_v45 = vadd.f32 %v499_v41, %v498_v38 }
 0x107   : > { %509 = vadd.xlane.f32.xlu0 %v508_v45  ;;  %v511_v46 = vadd.f32 %v501_v44, %v500_v43  ;;  %v459_v58 = vpop.f32.mrb[8].mxu0 }
 0x108   : > { %v478_v59 = vmax.f32 %v459_v58, 0.0  ;;  %v461_v60 = vpop.f32.mrb[9].mxu0 }
 0x109   : > { %v479_v61 = vmax.f32 %v461_v60, 0.0  ;;  %v463_v62 = vpop.f32.mrb[10].mxu0  ;;  %v325_v60 = vld [vmem:[%s1517_s5] sm:$0xff] }
 0x10a   : > { %v480_v63 = vmax.f32 %v463_v62, 0.0  ;;  %v465_v1 = vpop.f32.mrb[11].mxu0 }
 0x10b   : > { %512 = vadd.xlane.f32.xlu0 %v511_v46  ;;  %v481_v2 = vmax.f32 %v465_v1, 0.0 }
 0x10c   : > { %v1065_v3 = vpack.c.bf16 %v480_v63, %v478_v59 }
 0x10d   : > { %v1063_v4 = vpack.c.bf16 %v481_v2, %v479_v61 }
 0x10f   : > { %v469_v41 = vpop.f32.mrb[12].mxu0 }
 0x110   : > { %v471_v43 = vpop.f32.mrb[13].mxu0 }
 0x111   : > { %v473_v45 = vpop.f32.mrb[14].mxu0  ;;  %v483_v50 = vmax.f32 %v471_v43, 0.0 }
 0x112   : > { %v475_v46 = vpop.f32.mrb[15].mxu0 }
 0x18c   : > { %v504_v51 = vpop.xlane.xlu0 %503 }
 0x18e   : > { %v507_v52 = vpop.xlane.xlu1 %506 }
 0x18f   : > { %v1058_v53 = vpack.c.bf16 %v507_v52, %v504_v51  ;;  %v485_v51 = vmax.f32 %v475_v46, 0.0  ;;  %v482_v52 = vmax.f32 %v469_v41, 0.0 }
 0x191   : > { %1059 = vmatpush3.bf16.msra.mxu1 %v1058_v53  ;;  %v484_v53 = vmax.f32 %v473_v45, 0.0 }
 0x192   : > { %1060 = vmatprep.subr.bf16.mxu1 %v1206_v47 }
 0x194   : > { %v510_v54 = vpop.xlane.xlu0 %509 }
 0x198   : > { %v513_v55 = vpop.xlane.xlu0 %512 }
 0x199   : > { %v1061_v56 = vpack.c.bf16 %v513_v55, %v510_v54  ;;  %v1067_v55 = vpack.c.bf16 %v485_v51, %v483_v50 }
 0x19b   : > { %1062 = vmatpush3.bf16.msra.mxu1 %v1061_v56  ;;  %v1069_v56 = vpack.c.bf16 %v484_v53, %v482_v52 }
 0x19c   : > { %1064 = vmatprep.subr.bf16.mxu1 %v1063_v4 }
 0x19e   : > { %1044 = vmatmul.mubr.msk.f32.vlgmr.msra.gmra.mrb[0].mxu1 %vm514_vm4, %v1395_v57 }
 0x19f   : > { %702 = vmatprep.mubr.f32.mxu1 %v1208_v48  ;;  %1066 = vmatpush1.bf16.msra.mxu1 %v1065_v3 }
 0x1a0   : > { %1068 = vmatprep.subr.bf16.mxu1 %v1067_v55 }
 0x1a3   : > { %1070 = vmatpush1.bf16.msra.mxu1 %v1069_v56 }
 0x1a4   : > { %1071 = vmatprep.subr.bf16.mxu1 %v1206_v47 }
 0x271   : > { %v584_v6 = vpop.f32.mrb[0].mxu1 }
 0x272   : > { %v1406_v7 = vadd.f32 %v584_v6, %v1403_v5  ;;  %v1045_v8 = vpop.f32.mrb[1].mxu1 }
 0x274   : > { %v589_v9 = vsel %vm588_vm5, %v1406_v7, -inf }
 0x275   : > { %v590_v10 = vrot.slane %v589_v9, 4 }
 0x277   : > { %v591_v11 = vmax.f32 %v589_v9, %v590_v10 }
 0x279   : > { %v592_v12 = vrot.slane %v591_v11, 2 }
 0x27b   : > { %v593_v14 = vmax.f32 %v591_v11, %v592_v12 }
 0x27d   : > { %v594_v18 = vrot.slane %v593_v14, 1 }
 0x27f   : > { %v595_v23 = vmax.f32 %v593_v14, %v594_v18 }
 0x281   : > { %vm596_vm6 = vcmp.eq.f32.partialorder %v1406_v7, %v595_v23 }
 0x282   : > { %v597_v24 = vsel %vm596_vm6, %v1411_v20, 8 }
 0x283   : > { %v598_v26 = vsel %vm588_vm5, %v597_v24, 2147483647 }
 0x284   : > { %v599_v27 = vrot.slane %v598_v26, 4 }
 0x286   : > { %vm600_vm7 = vcmp.lt.s32.totalorder %v598_v26, %v599_v27 }
 0x287   : > { %v601_v28 = vsel %vm600_vm7, %v598_v26, %v599_v27 }
 0x288   : > { %v602_v29 = vrot.slane %v601_v28, 2 }
 0x28a   : > { %vm603_vm8 = vcmp.lt.s32.totalorder %v601_v28, %v602_v29 }
 0x28b   : > { %v604_v30 = vsel %vm603_vm8, %v601_v28, %v602_v29  ;;  %v1209_v29 = vmov 1966171168  }
 0x28c   : > { %v605_v33 = vrot.slane %v604_v30, 1 }
 0x28e   : > { %vm606_vm9 = vcmp.lt.s32.totalorder %v604_v30, %v605_v33 }
 0x28f   : > { %v607_v36 = vsel %vm606_vm9, %v604_v30, %v605_v33  ;;  %v725_v30 = vunpack.c.l.s4 %v1209_v29 }
 0x290   : > { %vm608_vm10 = vcmp.eq.s32.totalorder %v1411_v20, %v607_v36 }
 0x291   : > { %v609_v38 = vsel %vm608_vm10, 1, %v1204_v0  ;;  %v622_v39 = vsel %vm608_vm10, %v327_v34, 0.0 }
 0x292   : > { %v623_v42 = vsel %vm588_vm5, %v622_v39, 0.0  ;;  %611 = vperm.xlu1 %1123, %v609_v38  }
 0x293   : > { %v624_v44 = vrot.slane %v623_v42, 4 }
 0x295   : > { %v625_v49 = vadd.f32 %v624_v44, %v623_v42 }
 0x297   : > { %v626_v54 = vrot.slane %v625_v49, 2 }
 0x299   : > { %v627_v58 = vadd.f32 %v626_v54, %v625_v49  ;;  %v764_v54 = vsub.s32 0, %v1411_v20 }
 0x29b   : > { %v628_v0 = vrot.slane %v627_v58, 1 }
 0x29d   : > { %v629_v59 = vadd.f32 %v628_v0, %v627_v58 }
 0x29f   : > { %632 = vperm.xlu0 %1122, %v629_v59  }
 0x311   : > { %v612_v61 = vpop.permute.xlu1 %611 }
 0x312   : > { %vm613_vm11 = vcmp.eq.s32.totalorder %v612_v61, 1 }
 0x313   : > { %v614_v62 = vsel %vm613_vm11, %v325_v60, 0.0 }
 0x314   : > { %v615_v63 = vsel %vm514_vm4, %v614_v62, 0.0 }
 0x315   : > { %v616_v1 = vrot.slane %v615_v63, 4 }
 0x317   : > { %v617_v2 = vadd.f32 %v616_v1, %v615_v63 }
 0x319   : > { %v618_v3 = vrot.slane %v617_v2, 2 }
 0x31b   : > { %v619_v4 = vadd.f32 %v618_v3, %v617_v2 }
 0x31d   : > { %v620_v6 = vrot.slane %v619_v4, 1 }
 0x31e   : > { %v633_v9 = vpop.permute.xlu0 %632 }
 0x31f   : > { %v621_v8 = vadd.f32 %v620_v6, %v619_v4 }
 0x321   : > { %1014 = vmatmul.mubr.msk.f32.vlgmr.msra.gmra.mrb[2].mxu1 %vm514_vm4, %v621_v8 }
 0x322   : > { %1054 = vmatprep.mubr.msk.f32.mxu1 %vm1207_vm3, %v1208_v48  ;;  %v726_v48 = vunpack.c.0.s8 %v725_v30 }
 0x324   : > { %v729_v34 = vsub.s32 %v726_v48, %v1411_v20 }
 0x3f4   : > { %v704_v10 = vpop.f32.mrb[2].mxu1 }
 0x3f5   : > { %v705_v11 = vadd.f32 %v704_v10, %v633_v9  ;;  %v706_v12 = vpop.f32.mrb[3].mxu1 }
 0x3f6   : > { %v707_v14 = vadd.f32 %v706_v12, %v633_v9 }
 0x3f7   : > { %v1015_v18 = vmul.f32 -1.442695, %v705_v11 }
 0x3f8   : > { %v1016_v23 = vmul.f32 -1.442695, %v707_v14 }
 0x3f9   : > { %1130 = vpow2.f32 %v1015_v18 }
 0x3fa   : > { %1132 = vpow2.f32 %v1016_v23 }
 0x403   : > { %v1131_v24 = vpop.eup %1130 }
 0x404   : > { %v1133_v26 = vpop.eup %1132  ;;  %v715_v27 = vadd.f32 1.0, %v1131_v24 }
 0x405   : > { %v716_v28 = vadd.f32 1.0, %v1133_v26 }
 0x406   : > { %1134 = vrcp.f32 %v715_v27 }
 0x407   : > { %1136 = vrcp.f32 %v716_v28 }
 0x410   : > { %v1135_v33 = vpop.eup %1134 }
 0x411   : > { %v1137_v36 = vpop.eup %1136  ;;  %v750_v38 = vsel %vm744_vm12, %v1135_v33, -inf  ;;  %v745_v39 = vsel %vm744_vm12, %v1135_v33, inf }
 0x412   : > { %v751_v41 = vsel %vm744_vm12, %v1137_v36, -inf  ;;  %v746_v42 = vsel %vm744_vm12, %v1137_v36, inf  ;;  %v723_v43 = vcombine.low %v1135_v33, %v1137_v36 }
 0x413   : > { %v752_v44 = vmax.f32 %v750_v38, %v751_v41  ;;  %v747_v45 = vmin.f32 %v745_v39, %v746_v42 }
 0x414   : > { %v730_v46 = vrot.slane %v723_v43, %v729_v34 }
 0x415   : > { %753 = vmax.xlane.f32.xlu0 %v752_v44  ;;  %748 = vmin.xlane.f32.xlu1 %v747_v45 }
 0x416   : > { %v737_v49 = vrot.slane %v730_v46, %v729_v34 }
 0x418   : > { %743 = vst.msk [vmem:[%s305_s26] sm:$0x3] %vm741_vm13, %v737_v49 }
 0x4a2   : > { %v754_v50 = vpop.xlane.xlu0 %753  ;;  %v749_v51 = vpop.xlane.xlu1 %748 }
 0x4a3   : > { %v757_v52 = vsub.f32 %v754_v50, %v749_v51  ;;  %v755_v55 = vsub.f32 %v1135_v33, %v749_v51  ;;  %v756_v56 = vsub.f32 %v1137_v36, %v749_v51 }
 0x4a5   : > { %v758_v53 = vadd.f32 1e-08, %v757_v52 }
 0x4a7   : > { %1138 = vrcp.f32 %v758_v53 }
 0x4b1   : > { %v1139_v58 = vpop.eup %1138 }
 0x4b2   : > { %v760_v0 = vmul.f32 %v1139_v58, %v755_v55  ;;  %v761_v59 = vmul.f32 %v1139_v58, %v756_v56 }
 0x4b4   : > { %v765_v60 = vrot.slane %v760_v0, %v764_v54  ;;  %v769_v61 = vrot.slane %v761_v59, %v764_v54 }
 0x4b6   : > { %v772_v62 = vmul.f32 %v765_v60, %v1351_v21  ;;  %v773_v63 = vmul.f32 %v769_v61, %v1357_v25  ;;  %v770_v1 = vmul.f32 %v765_v60, %v1341_v16  ;;  %v771_v2 = vmul.f32 %v769_v61, %v1347_v19 }
 0x4b7   : > { %v776_v3 = vmul.f32 %v765_v60, %v1371_v37  ;;  %v777_v4 = vmul.f32 %v769_v61, %v1375_v40  ;;  %v774_v20 = vmul.f32 %v765_v60, %v1361_v31  ;;  %v775_v6 = vmul.f32 %v769_v61, %v1367_v35 }
 0x4b8   : > { %v780_v8 = vadd.f32 %v772_v62, %v1343_v17  ;;  %v781_v9 = vadd.f32 %v773_v63, %v1343_v17  ;;  %v778_v21 = vadd.f32 %v770_v1, %v1339_v15  ;;  %v779_v25 = vadd.f32 %v771_v2, %v1339_v15 }
 0x4b9   : > { %v784_v16 = vadd.f32 %v776_v3, %v1363_v32  ;;  %v785_v19 = vadd.f32 %v777_v4, %v1363_v32  ;;  %v782_v37 = vadd.f32 %v774_v20, %v1353_v22  ;;  %v783_v40 = vadd.f32 %v775_v6, %v1353_v22 }
 0x4ba   : > { %v788_v10 = vmax.f32 %v780_v8, 0.0  ;;  %v789_v31 = vmax.f32 %v781_v9, 0.0  ;;  %v786_v11 = vmax.f32 %v778_v21, 0.0  ;;  %v787_v35 = vmax.f32 %v779_v25, 0.0 }
 0x4bb   : > { %v792_v12 = vmax.f32 %v784_v16, 0.0  ;;  %v793_v14 = vmax.f32 %v785_v19, 0.0  ;;  %v790_v18 = vmax.f32 %v782_v37, 0.0  ;;  %v791_v17 = vmax.f32 %v783_v40, 0.0 }
 0x4bc   : > { %v797_v23 = vadd.f32 %v789_v31, %v788_v10  ;;  %v794_v24 = vadd.f32 %v787_v35, %v786_v11 }
 0x4bd   : > { %v803_v26 = vadd.f32 %v793_v14, %v792_v12  ;;  %v800_v15 = vadd.f32 %v791_v17, %v790_v18 }
 0x4be   : > { %798 = vadd.xlane.f32.xlu0 %v797_v23  ;;  %795 = vadd.xlane.f32.xlu1 %v794_v24 }
 0x4c2   : > { %804 = vadd.xlane.f32.xlu0 %v803_v26  ;;  %801 = vadd.xlane.f32.xlu1 %v800_v15 }
 0x4d3   : > { %879 = vperm.xlu1 %1123, %v1406_v7  }
 0x54b   : > { %v799_v22 = vpop.xlane.xlu0 %798  ;;  %v796_v32 = vpop.xlane.xlu1 %795 }
 0x54c   : > { %v1072_v27 = vpack.c.bf16 %v799_v22, %v796_v32 }
 0x54e   : > { %1073 = vmatpush3.bf16.msra.mxu1 %v1072_v27 }
 0x54f   : > { %v805_v28 = vpop.xlane.xlu0 %804  ;;  %v802_v29 = vpop.xlane.xlu1 %801  ;;  %1074 = vmatprep.subr.bf16.mxu1 %v1206_v47 }
 0x550   : > { %v1075_v30 = vpack.c.bf16 %v805_v28, %v802_v29 }
 0x552   : > { %1076 = vmatpush3.bf16.msra.mxu1 %v1075_v30 }
 0x555   : > { %1055 = vmatmul.mubr.msk.f32.vlgmr.msra.gmra.mrb[4].mxu1 %vm514_vm4, %v1395_v57 }
 0x628   : > { %v872_v48 = vpop.f32.mrb[4].mxu1 }
 0x629   : > { %v873_v33 = vadd.f32 %v872_v48, %v1403_v5  ;;  %v1056_v7 = vpop.f32.mrb[5].mxu1 }
 0x62b   : > { %884 = vperm.xlu0 %1122, %v873_v33  }
 0x62c   : > { %1153 = shalt.err (!%p1150_p3)
}
 0x62d   : > { %s1154_s9 = scalar_lea.hbm %s1468_s19, 32  ;;  %s1158_s26 = scalar_lea.hbm %s1520_s8, 64 }
 0x62e   : > { %p1155_p4 = scmp.ne.s32.totalorder %s1468_s19, %s1154_s9  ;;  %p1159_p9 = scmp.lt.u32.totalorder %s1468_s19, %s1520_s8 }
 0x62f   : > { %p1160_p10 = scmp.lt.u32.totalorder %s1158_s26, %s1154_s9  ;;  %p1162_p12 = scmp.lt.u32.totalorder %s1154_s9, %s1468_s19 }
 0x630   : > { %p1156_p7 = pnand %p1155_p4, %p1294_p5 }
 0x631   : > { %p1161_p11 = por %p1160_p10, %p1159_p9 }
 0x632   : > { %p1157_p8 = pneg %p1156_p7 }
 0x633   : > { %p1163_p13 = por %p1162_p12, %p1161_p11 }
 0x635   : > { %p1164_p0 = pnand %p1163_p13, %p1157_p8 }
 0x637   : > { %1167 = shalt.err (!%p1164_p0)
}
 0x638   : > { %1077 = dma.vmem_to_hbm [thread:$0]  (%p1294_p5), %s913_s12, 32, %s1468_s19, %s895_s21   ;;  %v355_v47 = vand.u32 127, %v352_v13  ;;  %vm888_vm15 = vcmask 15360   ;;  %v880_v57 = vpop.permute.xlu1 %879 }
 0x639   : > { %s1526_s0 = sshll.u32 %s1308_s17, 3 }
 0x63a   : > { %vm876_vm14 = vcmp.eq.s32.totalorder %v355_v47, 0  ;;  %s314_s22 = scalar_lea.vmem %s1519_s7, %s1526_s0 }
 0x6aa   : > { %v885_v5 = vpop.permute.xlu0 %884 }
 0x6ab   : > { %v887_v34 = vsel %vm876_vm14, %v880_v57, %v885_v5 }
 0x6ac   : > { %889 = vst.msk [vmem:[%s314_s22] sm:$0xff] %vm888_vm15, %v887_v34 }
 0x6ad PF: > { %p1083_p1 = scmp.ge.s32.totalorder %s1202_s30, 2  ;;  %s931_s15 = sand.u32 1, %s1190_s27  }
 0x6ae   : > { %s932_s12 = scalar_lea.sflag [#allocation3], %s931_s15 }
 0x6af   : > { %p1080_p5 = pnand %p1083_p1, %p1298_p6 }
 0x6b1   : > { %1185 = dma.done.wait (!%p1080_p5), %s932_s12, 32  }
 0x6b2   : > { %1187 = vsyncadd (!%p1080_p5), %s932_s12, 4294967264  ;;  %p19_p2 = scmp.ge.s32.totalorder %s1281_s11, 4   ;;  %s1527_s27 = smov %s1194_s28 }
 0x6b3   : > { %s1528_s28 = smov %s1198_s29  ;;  %s1529_s29 = smov %s1292_s14 }
 0x6b4   : > { %s1530_s30 = smov %s1281_s11  ;;  %21 = sbr.rel (!%p19_p2) target bundleno = 5 (0x5), region = 95 }
 0x6bb   :  { %937 = vsyncpa [#allocation3], 1 }
 0x6bc   :  { %939 = vsyncpa [#allocation3 + $0x1], 1 }

</bundles_post_ra>
